<compile_context>
chip_gen: v5e
topology: v5e:2x2
jax: 0.10.0
libtpu: 0.0.40
codegen_flags: <defaults>
</compile_context>

<pallas_src>
import jax
import jax.numpy as jnp
from jax.experimental import pallas as pl
from jax.experimental.pallas import tpu as pltpu

_LANES = 128      # TPU lane width: hidden + W4 columns are padded to a multiple
_TB_MAX = 2048    # max batch rows per grid step (out tile 2048*4*4B = 32 KiB)


def _round_up(n: int, m: int) -> int:
    return -(-n // m) * m


def _encoder_kernel(t_ref, x_ref, w1_ref, b1_ref, w2_ref, b2_ref,
                    w3_ref, b3_ref, w4_ref, b4_ref, out_ref):
    """Fused 4x (matmul + bias [+ ReLU]) for one batch tile.

    Layer 1 (contraction dim = data_dim, tiny) runs on the VPU as broadcast
    FMAs; layers 2-4 run on the MXU in the weight dtype (bf16) with f32
    accumulation. Only the real out_dim lanes are stored.
    """
    del t_ref  # timestep only drives the weight BlockSpec index_maps
    wdt = w2_ref.dtype
    out_dim = out_ref.shape[-1]
    data_dim = x_ref.shape[-1]

    # Layer 1: (tb, D) @ (D, Hp) with D tiny -> D broadcast-FMAs on the VPU.
    x = x_ref[...]                                      # (tb, D) f32
    w1 = w1_ref[...].astype(jnp.float32)                # (D, Hp)
    h = b1_ref[...]                                     # (1, Hp), broadcasts up
    for k in range(data_dim):
        h = h + x[:, k:k + 1] * w1[k:k + 1, :]
    h = jnp.maximum(h, 0.0)

    # Layers 2-4: MXU matmuls, f32 accumulation.
    h = jnp.dot(h.astype(wdt), w2_ref[...], preferred_element_type=jnp.float32)
    h = jnp.maximum(h + b2_ref[...], 0.0)
    h = jnp.dot(h.astype(wdt), w3_ref[...], preferred_element_type=jnp.float32)
    h = jnp.maximum(h + b3_ref[...], 0.0)
    y = jnp.dot(h.astype(wdt), w4_ref[...], preferred_element_type=jnp.float32)
    y = y + b4_ref[...]
    out_ref[...] = y[:, :out_dim].astype(out_ref.dtype)  # drop the lane padding


@jax.jit
def diffusion_encoder_forward(x, params, timestep):
    """x: (batch, data_dim) f32; timestep: (1,) int32; params: see init_params."""
    w1, b1 = params["w1"], params["b1"]                   # (D, Hp),   (1, Hp)
    w2, b2 = params["w2"], params["b2"]                   # (Hp, Hp),  (1, Hp)
    w3_all, b3_all = params["w3_all"], params["b3_all"]   # (T, Hp, Hp), (T, 1, Hp)
    w4_all, b4_all = params["w4_all"], params["b4_all"]   # (T, Hp, P),  (T, 1, P)

    batch, data_dim = x.shape
    hidden_p = w2.shape[0]
    out_pad = w4_all.shape[-1]
    out_dim = 2 * data_dim

    # Batch tiling: <= _TB_MAX rows per step, minimal padding, and >= 2 grid
    # steps whenever possible so v7x's two TensorCores both get work.
    bpad = _round_up(batch, 8)
    num_tiles = -(-bpad // _TB_MAX)
    if num_tiles == 1 and bpad >= 16:
        num_tiles = 2
    tb = _round_up(-(-bpad // num_tiles), 8)
    bpad = tb * num_tiles
    if bpad != batch:
        x = jnp.pad(x, ((0, bpad - batch), (0, 0)))
    grid = (num_tiles,)

    # Grid-invariant weights: constant block index -> DMA'd once, VMEM-resident.
    const = lambda shape: pl.BlockSpec(shape, lambda i, t, _s=shape: (0,) * len(_s))
    # Per-timestep stacked params: scalar-prefetched timestep picks the slab.
    t_sel = lambda shape: pl.BlockSpec((None,) + shape, lambda i, t: (t[0], 0, 0))

    out = pl.pallas_call(
        _encoder_kernel,
        out_shape=jax.ShapeDtypeStruct((bpad, out_dim), jnp.float32),
        grid_spec=pltpu.PrefetchScalarGridSpec(
            num_scalar_prefetch=1,
            grid=grid,
            in_specs=[
                pl.BlockSpec((tb, data_dim), lambda i, t: (i, 0)),   # x batch tile
                const(w1.shape), const(b1.shape),
                const(w2.shape), const(b2.shape),
                t_sel((hidden_p, hidden_p)), t_sel((1, hidden_p)),
                t_sel((hidden_p, out_pad)), t_sel((1, out_pad)),
            ],
            # out_dim (= 4) equals the full last dim, so this block is legal and
            # only the real output bytes hit HBM.
            out_specs=pl.BlockSpec((tb, out_dim), lambda i, t: (i, 0)),
        ),
        compiler_params=pltpu.CompilerParams(
            dimension_semantics=("parallel",),   # v7x: 2 TCs split the batch grid
        ),
    )(timestep, x, w1, b1, w2, b2, w3_all, b3_all, w4_all, b4_all)

    return out[:batch]


def init_params(key, data_dim, hidden_dim, num_timesteps,
                weight_dtype=jnp.bfloat16):
    """PyTorch nn.Linear-style init (uniform +-1/sqrt(fan_in)).

    Weights are stored (in, out) so the kernel computes y = x @ W + b (W is the
    transpose of the PyTorch module weight). The hidden dim is zero-padded to a
    multiple of 128 lanes (padded units have zero weights/biases, so the math is
    unchanged) and the last layer's output dim (2*data_dim) is zero-padded to
    128 lanes for the MXU; the kernel slices the padding away before storing.
    Weights are cast to `weight_dtype` (bf16 -> native MXU); biases stay f32.
    """
    hid_p = _round_up(hidden_dim, _LANES)
    hpad = hid_p - hidden_dim
    out_dim = data_dim * 2
    out_pad = _round_up(out_dim, _LANES)
    opad = out_pad - out_dim

    def linear(k, fan_in, fan_out, pad_in, pad_out):
        kw, kb = jax.random.split(k)
        bound = 1.0 / float(fan_in) ** 0.5
        w = jax.random.uniform(kw, (fan_in, fan_out), jnp.float32, -bound, bound)
        b = jax.random.uniform(kb, (1, fan_out), jnp.float32, -bound, bound)
        w = jnp.pad(w, ((0, pad_in), (0, pad_out)))
        b = jnp.pad(b, ((0, 0), (0, pad_out)))
        return w, b

    keys = jax.random.split(key, 2 + 2 * num_timesteps)
    w1, b1 = linear(keys[0], data_dim, hidden_dim, 0, hpad)
    w2, b2 = linear(keys[1], hidden_dim, hidden_dim, hpad, hpad)

    w3s, b3s, w4s, b4s = [], [], [], []
    for t in range(num_timesteps):
        w3, b3 = linear(keys[2 + 2 * t], hidden_dim, hidden_dim, hpad, hpad)
        w4, b4 = linear(keys[3 + 2 * t], hidden_dim, out_dim, hpad, opad)
        w3s.append(w3); b3s.append(b3)
        w4s.append(w4); b4s.append(b4)

    wd = weight_dtype
    return {
        "w1": w1.astype(wd), "b1": b1,
        "w2": w2.astype(wd), "b2": b2,
        "w3_all": jnp.stack(w3s).astype(wd), "b3_all": jnp.stack(b3s),
        "w4_all": jnp.stack(w4s).astype(wd), "b4_all": jnp.stack(b4s),
    }


def reference_forward(x, params, timestep, data_dim):
    """Plain-JAX reference with the same dtype contract as the kernel."""
    f32 = jnp.float32
    wdt = params["w1"].dtype
    h = jnp.dot(x.astype(wdt), params["w1"], preferred_element_type=f32) + params["b1"]
    h = jnp.maximum(h, 0.0)
    h = jnp.dot(h.astype(wdt), params["w2"], preferred_element_type=f32) + params["b2"]
    h = jnp.maximum(h, 0.0)
    w3, b3 = params["w3_all"][timestep], params["b3_all"][timestep]
    w4, b4 = params["w4_all"][timestep], params["b4_all"][timestep]
    h = jnp.dot(h.astype(wdt), w3, preferred_element_type=f32) + b3
    h = jnp.maximum(h, 0.0)
    y = jnp.dot(h.astype(wdt), w4, preferred_element_type=f32) + b4
    return y[:, :2 * data_dim]


if __name__ == "__main__":
    # Small config consistent with the swiss-roll setup.
    data_dim = 2
    hidden_dim = 32
    num_timesteps = 4
    batch = 8
    timestep = 2

    key = jax.random.PRNGKey(0)
    k_params, k_x = jax.random.split(key)
    params = init_params(k_params, data_dim, hidden_dim, num_timesteps)
    x = jax.random.normal(k_x, (batch, data_dim), jnp.float32)
    t = jnp.array([timestep], jnp.int32)   # traced arg: no retrace per timestep

    out = diffusion_encoder_forward(x, params, t)
    out = jax.block_until_ready(out)

    ref = reference_forward(x, params, timestep, data_dim)
    assert out.shape == (batch, data_dim * 2), out.shape
    assert jnp.allclose(out, ref, atol=1e-3, rtol=1e-3), float(jnp.max(jnp.abs(out - ref)))

    print("KERNEL_OK")
</pallas_src>

<mosaic_0001>
module attributes {stable_mosaic.version = 11 : i64} {
  func.func @_encoder_kernel(%arg0: i32, %arg1: memref<1xi32, #tpu.memory_space<smem>>, %arg2: memref<8x2xf32, #tpu.memory_space<vmem>>, %arg3: memref<2x128xbf16, #tpu.memory_space<vmem>>, %arg4: memref<1x128xf32, #tpu.memory_space<vmem>>, %arg5: memref<128x128xbf16, #tpu.memory_space<vmem>>, %arg6: memref<1x128xf32, #tpu.memory_space<vmem>>, %arg7: memref<1x128x128xbf16, #tpu.memory_space<vmem>>, %arg8: memref<1x1x128xf32, #tpu.memory_space<vmem>>, %arg9: memref<1x128x128xbf16, #tpu.memory_space<vmem>>, %arg10: memref<1x1x128xf32, #tpu.memory_space<vmem>>, %arg11: memref<8x4xf32, #tpu.memory_space<vmem>>) attributes {dimension_semantics = [#tpu.dimension_semantics<parallel>], iteration_bounds = array<i64: 1>, scalar_prefetch = 1 : i64, scratch_operands = 0 : i64, tpu.core_type = #tpu.core_type<tc>, window_params = [{transform_indices = @transform_0, window_bounds = array<i64: 8, 2>}, {pipeline_mode = #tpu.pipeline_mode<synchronous>, transform_indices = @transform_1, window_bounds = array<i64: 2, 128>}, {pipeline_mode = #tpu.pipeline_mode<synchronous>, transform_indices = @transform_2, window_bounds = array<i64: 1, 128>}, {pipeline_mode = #tpu.pipeline_mode<synchronous>, transform_indices = @transform_3, window_bounds = array<i64: 128, 128>}, {pipeline_mode = #tpu.pipeline_mode<synchronous>, transform_indices = @transform_4, window_bounds = array<i64: 1, 128>}, {transform_indices = @transform_5, window_bounds = array<i64: 1, 128, 128>}, {transform_indices = @transform_6, window_bounds = array<i64: 1, 1, 128>}, {transform_indices = @transform_7, window_bounds = array<i64: 1, 128, 128>}, {transform_indices = @transform_8, window_bounds = array<i64: 1, 1, 128>}, {transform_indices = @transform_9, window_bounds = array<i64: 8, 4>}]} {
    %c0 = arith.constant 0 : index
    %c0_0 = arith.constant 0 : index
    %0 = vector.load %arg2[%c0, %c0_0] : memref<8x2xf32, #tpu.memory_space<vmem>>, vector<8x2xf32>
    %c0_1 = arith.constant 0 : index
    %c0_2 = arith.constant 0 : index
    %1 = vector.load %arg3[%c0_1, %c0_2] : memref<2x128xbf16, #tpu.memory_space<vmem>>, vector<2x128xbf16>
    %2 = arith.extf %1 : vector<2x128xbf16> to vector<2x128xf32>
    %c0_3 = arith.constant 0 : index
    %c0_4 = arith.constant 0 : index
    %3 = vector.load %arg4[%c0_3, %c0_4] : memref<1x128xf32, #tpu.memory_space<vmem>>, vector<1x128xf32>
    %4 = vector.extract_strided_slice %0 {offsets = [0, 0], sizes = [8, 1], strides = [1, 1]} : vector<8x2xf32> to vector<8x1xf32>
    %5 = vector.extract_strided_slice %2 {offsets = [0, 0], sizes = [1, 128], strides = [1, 1]} : vector<2x128xf32> to vector<1x128xf32>
    %6 = vector.broadcast %4 : vector<8x1xf32> to vector<8x128xf32>
    %7 = vector.broadcast %5 : vector<1x128xf32> to vector<8x128xf32>
    %8 = arith.mulf %6, %7 : vector<8x128xf32>
    %9 = vector.broadcast %3 : vector<1x128xf32> to vector<8x128xf32>
    %10 = arith.addf %9, %8 : vector<8x128xf32>
    %11 = vector.extract_strided_slice %0 {offsets = [0, 1], sizes = [8, 1], strides = [1, 1]} : vector<8x2xf32> to vector<8x1xf32>
    %12 = vector.extract_strided_slice %2 {offsets = [1, 0], sizes = [1, 128], strides = [1, 1]} : vector<2x128xf32> to vector<1x128xf32>
    %13 = vector.broadcast %11 : vector<8x1xf32> to vector<8x128xf32>
    %14 = vector.broadcast %12 : vector<1x128xf32> to vector<8x128xf32>
    %15 = arith.mulf %13, %14 : vector<8x128xf32>
    %16 = arith.addf %10, %15 : vector<8x128xf32>
    %cst = arith.constant 0.000000e+00 : f32
    %17 = vector.broadcast %cst : f32 to vector<8x128xf32>
    %18 = arith.maximumf %16, %17 : vector<8x128xf32>
    %19 = arith.truncf %18 : vector<8x128xf32> to vector<8x128xbf16>
    %c0_5 = arith.constant 0 : index
    %c0_6 = arith.constant 0 : index
    %20 = vector.load %arg5[%c0_5, %c0_6] : memref<128x128xbf16, #tpu.memory_space<vmem>>, vector<128x128xbf16>
    %cst_7 = arith.constant dense<0.000000e+00> : vector<8x128xf32>
    %21 = tpu.matmul %19, %20, %cst_7 {dimension_numbers = #tpu.dot_dimension_numbers<[1], [0], [0], [1], [0, 0, 1, 1], [], []>} : vector<8x128xbf16>, vector<128x128xbf16>, vector<8x128xf32> -> vector<8x128xf32>
    %c0_8 = arith.constant 0 : index
    %c0_9 = arith.constant 0 : index
    %22 = vector.load %arg6[%c0_8, %c0_9] : memref<1x128xf32, #tpu.memory_space<vmem>>, vector<1x128xf32>
    %23 = vector.broadcast %22 : vector<1x128xf32> to vector<8x128xf32>
    %24 = arith.addf %21, %23 : vector<8x128xf32>
    %cst_10 = arith.constant 0.000000e+00 : f32
    %25 = vector.broadcast %cst_10 : f32 to vector<8x128xf32>
    %26 = arith.maximumf %24, %25 : vector<8x128xf32>
    %27 = arith.truncf %26 : vector<8x128xf32> to vector<8x128xbf16>
    %c0_11 = arith.constant 0 : index
    %c0_12 = arith.constant 0 : index
    %c0_13 = arith.constant 0 : index
    %28 = vector.load %arg7[%c0_11, %c0_12, %c0_13] : memref<1x128x128xbf16, #tpu.memory_space<vmem>>, vector<1x128x128xbf16>
    %29 = vector.shape_cast %28 : vector<1x128x128xbf16> to vector<128x128xbf16>
    %cst_14 = arith.constant dense<0.000000e+00> : vector<8x128xf32>
    %30 = tpu.matmul %27, %29, %cst_14 {dimension_numbers = #tpu.dot_dimension_numbers<[1], [0], [0], [1], [0, 0, 1, 1], [], []>} : vector<8x128xbf16>, vector<128x128xbf16>, vector<8x128xf32> -> vector<8x128xf32>
    %c0_15 = arith.constant 0 : index
    %c0_16 = arith.constant 0 : index
    %c0_17 = arith.constant 0 : index
    %31 = vector.load %arg8[%c0_15, %c0_16, %c0_17] : memref<1x1x128xf32, #tpu.memory_space<vmem>>, vector<1x1x128xf32>
    %32 = vector.shape_cast %31 : vector<1x1x128xf32> to vector<1x128xf32>
    %33 = vector.broadcast %32 : vector<1x128xf32> to vector<8x128xf32>
    %34 = arith.addf %30, %33 : vector<8x128xf32>
    %cst_18 = arith.constant 0.000000e+00 : f32
    %35 = vector.broadcast %cst_18 : f32 to vector<8x128xf32>
    %36 = arith.maximumf %34, %35 : vector<8x128xf32>
    %37 = arith.truncf %36 : vector<8x128xf32> to vector<8x128xbf16>
    %c0_19 = arith.constant 0 : index
    %c0_20 = arith.constant 0 : index
    %c0_21 = arith.constant 0 : index
    %38 = vector.load %arg9[%c0_19, %c0_20, %c0_21] : memref<1x128x128xbf16, #tpu.memory_space<vmem>>, vector<1x128x128xbf16>
    %39 = vector.shape_cast %38 : vector<1x128x128xbf16> to vector<128x128xbf16>
    %cst_22 = arith.constant dense<0.000000e+00> : vector<8x128xf32>
    %40 = tpu.matmul %37, %39, %cst_22 {dimension_numbers = #tpu.dot_dimension_numbers<[1], [0], [0], [1], [0, 0, 1, 1], [], []>} : vector<8x128xbf16>, vector<128x128xbf16>, vector<8x128xf32> -> vector<8x128xf32>
    %c0_23 = arith.constant 0 : index
    %c0_24 = arith.constant 0 : index
    %c0_25 = arith.constant 0 : index
    %41 = vector.load %arg10[%c0_23, %c0_24, %c0_25] : memref<1x1x128xf32, #tpu.memory_space<vmem>>, vector<1x1x128xf32>
    %42 = vector.shape_cast %41 : vector<1x1x128xf32> to vector<1x128xf32>
    %43 = vector.broadcast %42 : vector<1x128xf32> to vector<8x128xf32>
    %44 = arith.addf %40, %43 : vector<8x128xf32>
    %45 = vector.extract_strided_slice %44 {offsets = [0, 0], sizes = [8, 4], strides = [1, 1]} : vector<8x128xf32> to vector<8x4xf32>
    %c0_26 = arith.constant 0 : index
    %c0_27 = arith.constant 0 : index
    %46 = vector.load %arg11[%c0_26, %c0_27] : memref<8x4xf32, #tpu.memory_space<vmem>>, vector<8x4xf32>
    tpu.vector_store %arg11[%c0_26, %c0_27], %45 {strides = array<i32>} : memref<8x4xf32, #tpu.memory_space<vmem>>, vector<8x4xf32>,
    return
  }
  func.func @transform_0(%arg0: i32, %arg1: memref<1xi32, #tpu.memory_space<smem>>) -> (i32, i32) {
    %c0_i32 = arith.constant 0 : i32
    %c0_i32_0 = arith.constant 0 : i32
    return %arg0, %c0_i32 : i32, i32
  }
  func.func @transform_1(%arg0: i32, %arg1: memref<1xi32, #tpu.memory_space<smem>>) -> (i32, i32) {
    %c0_i32 = arith.constant 0 : i32
    %c0_i32_0 = arith.constant 0 : i32
    %c0_i32_1 = arith.constant 0 : i32
    return %c0_i32, %c0_i32_0 : i32, i32
  }
  func.func @transform_2(%arg0: i32, %arg1: memref<1xi32, #tpu.memory_space<smem>>) -> (i32, i32) {
    %c0_i32 = arith.constant 0 : i32
    %c0_i32_0 = arith.constant 0 : i32
    %c0_i32_1 = arith.constant 0 : i32
    return %c0_i32, %c0_i32_0 : i32, i32
  }
  func.func @transform_3(%arg0: i32, %arg1: memref<1xi32, #tpu.memory_space<smem>>) -> (i32, i32) {
    %c0_i32 = arith.constant 0 : i32
    %c0_i32_0 = arith.constant 0 : i32
    %c0_i32_1 = arith.constant 0 : i32
    return %c0_i32, %c0_i32_0 : i32, i32
  }
  func.func @transform_4(%arg0: i32, %arg1: memref<1xi32, #tpu.memory_space<smem>>) -> (i32, i32) {
    %c0_i32 = arith.constant 0 : i32
    %c0_i32_0 = arith.constant 0 : i32
    %c0_i32_1 = arith.constant 0 : i32
    return %c0_i32, %c0_i32_0 : i32, i32
  }
  func.func @transform_5(%arg0: i32, %arg1: memref<1xi32, #tpu.memory_space<smem>>) -> (i32, i32, i32) {
    %c0 = arith.constant 0 : index
    %0 = memref.load %arg1[%c0] : memref<1xi32, #tpu.memory_space<smem>>
    %c0_i32 = arith.constant 0 : i32
    %c0_i32_0 = arith.constant 0 : i32
    %c0_i32_1 = arith.constant 0 : i32
    return %0, %c0_i32, %c0_i32_0 : i32, i32, i32
  }
  func.func @transform_6(%arg0: i32, %arg1: memref<1xi32, #tpu.memory_space<smem>>) -> (i32, i32, i32) {
    %c0 = arith.constant 0 : index
    %0 = memref.load %arg1[%c0] : memref<1xi32, #tpu.memory_space<smem>>
    %c0_i32 = arith.constant 0 : i32
    %c0_i32_0 = arith.constant 0 : i32
    %c0_i32_1 = arith.constant 0 : i32
    return %0, %c0_i32, %c0_i32_0 : i32, i32, i32
  }
  func.func @transform_7(%arg0: i32, %arg1: memref<1xi32, #tpu.memory_space<smem>>) -> (i32, i32, i32) {
    %c0 = arith.constant 0 : index
    %0 = memref.load %arg1[%c0] : memref<1xi32, #tpu.memory_space<smem>>
    %c0_i32 = arith.constant 0 : i32
    %c0_i32_0 = arith.constant 0 : i32
    %c0_i32_1 = arith.constant 0 : i32
    return %0, %c0_i32, %c0_i32_0 : i32, i32, i32
  }
  func.func @transform_8(%arg0: i32, %arg1: memref<1xi32, #tpu.memory_space<smem>>) -> (i32, i32, i32) {
    %c0 = arith.constant 0 : index
    %0 = memref.load %arg1[%c0] : memref<1xi32, #tpu.memory_space<smem>>
    %c0_i32 = arith.constant 0 : i32
    %c0_i32_0 = arith.constant 0 : i32
    %c0_i32_1 = arith.constant 0 : i32
    return %0, %c0_i32, %c0_i32_0 : i32, i32, i32
  }
  func.func @transform_9(%arg0: i32, %arg1: memref<1xi32, #tpu.memory_space<smem>>) -> (i32, i32) {
    %c0_i32 = arith.constant 0 : i32
    %c0_i32_0 = arith.constant 0 : i32
    return %arg0, %c0_i32 : i32, i32
  }
}

</mosaic_0001>

<bundles_post_ra>
// kernel: diffusion_encoder_forward.1
= control target key start
LH: loop header
LB: loop body
LE: loop exit
PB: predicated region body
PF: predicated region fallthrough
CT: control target
= control target key end

     0   :  { %16 = vsyncpa [#allocation5], 0  ;;  %s740_s0 = inlined_call_operand.<no memory space> [shape: s32[1], index: 0, kind: input, shape index: {}]   ;;  %s741_s1 = inlined_call_operand.vmem [shape: f32[8,2], index: 1, kind: input, shape index: {}]   ;;  %s742_s2 = inlined_call_operand.vmem [shape: bf16[2,128], index: 2, kind: input, shape index: {}]   ;;  %s743_s3 = inlined_call_operand.vmem [shape: f32[1,128], index: 3, kind: input, shape index: {}]   ;;  %s744_s4 = inlined_call_operand.hbm [shape: bf16[128,128], index: 4, kind: input, shape index: {}]   ;;  %s745_s5 = inlined_call_operand.vmem [shape: f32[1,128], index: 5, kind: input, shape index: {}]   ;;  %s746_s6 = inlined_call_operand.hbm [shape: bf16[4,128,128], index: 6, kind: input, shape index: {}]   ;;  %s747_s7 = inlined_call_operand.vmem [shape: f32[4,1,128], index: 7, kind: input, shape index: {}]   ;;  %s748_s8 = inlined_call_operand.hbm [shape: bf16[4,128,128], index: 8, kind: input, shape index: {}]   ;;  %s749_s9 = inlined_call_operand.vmem [shape: f32[4,1,128], index: 9, kind: input, shape index: {}]   ;;  %s750_s10 = inlined_call_operand.vmem [shape: f32[8,4], index: 10, kind: output, shape index: {}]  }
   0x1   :  { %17 = vsyncpa [#allocation7], 0  ;;  %s508_s15 = sshll.u32 %s740_s0, 6  ;;  %s623_s19 = smov [#allocation6]  }
   0x2   :  { %s46_s18 = scalar_lea.hbm %s746_s6, %s508_s15  ;;  %s49_s20 = sshll.u32 %s623_s19, 4  ;;  %s50_s20 = int_to_ptr.vmem [resolvable:$true] %s49_s20 }
   0x3   :  { %s47_s21 = sshll.u32 %s46_s18, 4  ;;  %s28_s24 = sshll.u32 %s744_s4, 4  ;;  %s48_s21 = int_to_ptr.hbm [resolvable:$true] %s47_s21  ;;  %s29_s24 = int_to_ptr.hbm [resolvable:$true] %s28_s24 }
   0x4   :  { %s547_s25 = sshra.s32 %s48_s21, 4  ;;  %s551_s29 = scalar_lea.hbm %s746_s6, 256  ;;  %s548_s25 = int_to_ptr.hbm [resolvable:$true] %s547_s25 }
   0x5   :  { %s549_s26 = scalar_lea.hbm %s548_s25, 64  ;;  %p552_p1 = scmp.lt.s32.totalorder %s548_s25, %s746_s6 }
   0x6   :  { %p550_p0 = scmp.ne.s32.totalorder %s548_s25, %s549_s26  ;;  %p553_p2 = scmp.lt.s32.totalorder %s551_s29, %s549_s26 }
   0x8   :  { %p554_p3 = por %p553_p2, %p552_p1 }
   0xa   :  { %p555_p4 = pnand %p554_p3, %p550_p0 }
   0xc   :  { %558 = shalt.err (!%p555_p4)
}
   0xd   :  { %s624_s12 = smov 64   ;;  %s625_s13 = smov 4  }
   0xe   :  { %55 = dma.hbm_to_vmem [thread:$0]  %s48_s21, 1024, %s50_s20, [#allocation7], %s624_s12, %s624_s12, %s625_s13  }
   0xf   :  { %s626_s4 = smov [#allocation4]   ;;  %s70_s18 = scalar_lea.hbm %s748_s8, %s508_s15 }
  0x10   :  { %s30_s14 = sshll.u32 %s626_s4, 4  ;;  %s71_s19 = sshll.u32 %s70_s18, 4  ;;  %s31_s14 = int_to_ptr.vmem [resolvable:$true] %s30_s14  ;;  %s72_s19 = int_to_ptr.hbm [resolvable:$true] %s71_s19 }
  0x11   :  { %36 = dma.hbm_to_vmem [thread:$0]  %s29_s24, 1024, %s31_s14, [#allocation5], %s624_s12, %s624_s12, %s625_s13  }
  0x12   :  { %s627_s22 = smov [#allocation8]   ;;  %s595_s23 = sshra.s32 %s72_s19, 4  ;;  %s596_s23 = int_to_ptr.hbm [resolvable:$true] %s595_s23 }
  0x13   :  { %s73_s6 = sshll.u32 %s627_s22, 4  ;;  %s597_s25 = scalar_lea.hbm %s596_s23, 64  ;;  %s74_s6 = int_to_ptr.vmem [resolvable:$true] %s73_s6 }
  0x14   :  { %p598_p5 = scmp.ne.s32.totalorder %s596_s23, %s597_s25  ;;  %s599_s21 = scalar_lea.hbm %s748_s8, 256 }
  0x15   :  { %p600_p6 = scmp.lt.s32.totalorder %s596_s23, %s748_s8  ;;  %p601_p7 = scmp.lt.s32.totalorder %s599_s21, %s597_s25 }
  0x17   :  { %p602_p8 = por %p601_p7, %p600_p6 }
  0x19   :  { %p603_p9 = pnand %p602_p8, %p598_p5 }
  0x1b   :  { %606 = shalt.err (!%p603_p9)
}
  0x1c   :  { %79 = dma.hbm_to_vmem [thread:$0]  %s72_s19, 1024, %s74_s6, [#allocation7], %s624_s12, %s624_s12, %s625_s13  }
  0x1d   :  { %619 = dma.done.wait [#allocation5], 1024  }
  0x1e   :  { %620 = vsyncadd [#allocation5], 4294966272 }
  0x1f   :  { %621 = dma.done.wait [#allocation7], 2048  }
  0x20   :  { %622 = vsyncadd [#allocation7], 4294965248  ;;  %v628_v0 = vmov 0   ;;  %v119_v1 = vld [vmem:[%s741_s1] sm:$0xff]  ;;  %v517_v2 = vld [vmem:[#allocation4 + $0x38] sm:$0xff]  ;;  %v629_v5 = vmov 1  }
  0x21   :  { %541 = vset.pattern.permute.xlu0 %v628_v0  ;;  %211 = vmatpush.bf16.msra.mxu0 %v517_v2  ;;  %v516_v3 = vld [vmem:[#allocation4 + $0x30] sm:$0xff]  ;;  %v515_v4 = vld [vmem:[#allocation4 + $0x28] sm:$0xff]  ;;  %v514_v6 = vld [vmem:[#allocation4 + $0x20] sm:$0xff]  ;;  %p109_p10 = scmp.lt.s32.totalorder %s740_s0, 3  ;;  %vm390_vm0 = vcmask 31744  }
  0x22   :  { %125 = vperm.xlu0 %541, %v119_v1   ;;  %v513_v7 = vld [vmem:[#allocation4 + $0x18] sm:$0xff]  ;;  %v512_v8 = vld [vmem:[#allocation4 + $0x10] sm:$0xff]  ;;  %v511_v9 = vld [vmem:[#allocation4 + $0x8] sm:$0xff] }
  0x23   :  { %v510_v10 = vld [vmem:[#allocation4] sm:$0xff]  ;;  %v525_v11 = vld [vmem:[#allocation6 + $0x38] sm:$0xff]  ;;  %v524_v12 = vld [vmem:[#allocation6 + $0x30] sm:$0xff]  ;;  %s752_s0 = smov (!%p109_p10, %s740_s0), 3 }
  0x24   :  { %294 = vmatpush.bf16.msra.mxu1 %v525_v11  ;;  %v523_v13 = vld [vmem:[#allocation6 + $0x28] sm:$0xff]  ;;  %v120_v14 = vld [vmem:[%s742_s2] sm:$0x1]  ;;  %v521_v18 = vld [vmem:[#allocation6 + $0x18] sm:$0xff]  ;;  %s111_s14 = scalar_lea.vmem %s747_s7, %s752_s0  ;;  %s117_s19 = scalar_lea.vmem %s749_s9, %s752_s0 }
  0x25   :  { %212 = vmatpush.bf16.msra.mxu0 %v516_v3  ;;  %v522_v15 = vld [vmem:[#allocation6 + $0x20] sm:$0xff]  ;;  %v121_v16 = vunpack.c.l.bf16 %v120_v14  ;;  %v520_v20 = vld [vmem:[#allocation6 + $0x10] sm:$0xff]  ;;  %v519_v30 = vld [vmem:[#allocation6 + $0x8] sm:$0xff] }
  0x26   :  { %v543_v21 = vld [vmem:[%s743_s3] ss:$0 sm:$0xff]  ;;  %v533_v32 = vld [vmem:[#allocation8 + $0x38] sm:$0xff]  ;;  %v532_v33 = vld [vmem:[#allocation8 + $0x30] sm:$0xff] }
  0x27   :  { %v128_v19 = vperm.slane %v121_v16, 0  ;;  %v138_v23 = vperm.slane %v121_v16, 1  ;;  %v518_v31 = vld [vmem:[#allocation6] sm:$0xff]  ;;  %377 = vmatpush.bf16.msra.mxu2 %v533_v32  ;;  %v531_v34 = vld [vmem:[#allocation8 + $0x28] sm:$0xff]  ;;  %v529_v36 = vld [vmem:[#allocation8 + $0x18] sm:$0xff] }
  0x28   :  { %295 = vmatpush.bf16.msra.mxu1 %v524_v12  ;;  %v530_v35 = vld [vmem:[#allocation8 + $0x20] sm:$0xff]  ;;  %v528_v37 = vld [vmem:[#allocation8 + $0x10] sm:$0xff]  ;;  %v527_v44 = vld [vmem:[#allocation8 + $0x8] sm:$0xff] }
  0x29   :  { %213 = vmatpush.bf16.msra.mxu0 %v515_v4  ;;  %v544_v38 = vld [vmem:[%s745_s5] ss:$0 sm:$0xff] }
  0x2a   :  { %542 = vset.pattern.permute.xlu0 %v629_v5  ;;  %v526_v45 = vld [vmem:[#allocation8] sm:$0xff] }
  0x2b   :  { %135 = vperm.xlu0 %542, %v119_v1   ;;  %378 = vmatpush.bf16.msra.mxu2 %v532_v33  ;;  %v545_v46 = vld [vmem:[%s111_s14] ss:$0 sm:$0xff] }
  0x2c   :  { %296 = vmatpush.bf16.msra.mxu1 %v523_v13  ;;  %v546_v52 = vld [vmem:[%s117_s19] ss:$0 sm:$0xff] }
  0x2d   :  { %214 = vmatpush.bf16.msra.mxu0 %v514_v6 }
  0x2f   :  { %379 = vmatpush.bf16.msra.mxu2 %v531_v34 }
  0x30   :  { %297 = vmatpush.bf16.msra.mxu1 %v522_v15 }
  0x31   :  { %215 = vmatpush.bf16.msra.mxu0 %v513_v7 }
  0x33   :  { %380 = vmatpush.bf16.msra.mxu2 %v530_v35 }
  0x34   :  { %298 = vmatpush.bf16.msra.mxu1 %v521_v18 }
  0x35   :  { %216 = vmatpush.bf16.msra.mxu0 %v512_v8 }
  0x37   :  { %381 = vmatpush.bf16.msra.mxu2 %v529_v36 }
  0x38   :  { %299 = vmatpush.bf16.msra.mxu1 %v520_v20 }
  0x39   :  { %217 = vmatpush.bf16.msra.mxu0 %v511_v9 }
  0x3b   :  { %382 = vmatpush.bf16.msra.mxu2 %v528_v37 }
  0x3c   :  { %300 = vmatpush.bf16.msra.mxu1 %v519_v30 }
  0x3d   :  { %218 = vmatpush.bf16.msra.mxu0 %v510_v10 }
  0x3f   :  { %383 = vmatpush.bf16.msra.mxu2 %v527_v44 }
  0x40   :  { %301 = vmatpush.bf16.msra.mxu1 %v518_v31 }
  0x43   :  { %384 = vmatpush.bf16.msra.mxu2 %v526_v45 }
  0x94   :  { %v126_v17 = vpop.permute.xlu0 %125 }
  0x95   :  { %v129_v22 = vmul.f32 %v128_v19, %v126_v17 }
  0x97   :  { %v133_v25 = vadd.f32 %v543_v21, %v129_v22 }
  0x9d   :  { %v136_v24 = vpop.permute.xlu0 %135 }
  0x9e   :  { %v139_v26 = vmul.f32 %v138_v23, %v136_v24 }
  0xa0   :  { %v140_v27 = vadd.f32 %v139_v26, %v133_v25 }
  0xa2   :  { %v141_v28 = vmax.f32 %v140_v27, 0.0 }
  0xa4   :  { %v142_v29 = vpack.c.bf16 %v141_v28, %v141_v28 }
  0xa6   :  { %219 = vmatmul.bf16.vlgmr.msra.gmra.mxu0 %v142_v29 }
 0x123   :  { %v220_v39 = vpop.f32.mrf.mxu0 }
 0x124   :  { %v221_v40 = vadd.f32 %v544_v38, %v220_v39 }
 0x126   :  { %v224_v41 = vmax.f32 %v221_v40, 0.0 }
 0x128   :  { %v225_v42 = vpack.c.bf16 %v224_v41, %v224_v41 }
 0x12a   :  { %302 = vmatmul.bf16.vlgmr.msra.gmra.mxu1 %v225_v42 }
 0x12b   :  { %v222_v43 = vpop.f32.mrf.mxu0 }
 0x1a7   :  { %v303_v47 = vpop.f32.mrf.mxu1 }
 0x1a8   :  { %v304_v48 = vadd.f32 %v545_v46, %v303_v47 }
 0x1aa   :  { %v307_v49 = vmax.f32 %v304_v48, 0.0 }
 0x1ac   :  { %v308_v50 = vpack.c.bf16 %v307_v49, %v307_v49 }
 0x1ae   :  { %385 = vmatmul.bf16.vlgmr.msra.gmra.mxu2 %v308_v50 }
 0x1af   :  { %v305_v51 = vpop.f32.mrf.mxu1 }
 0x231   :  { %v386_v53 = vpop.f32.mrf.mxu2 }
 0x232   :  { %v387_v54 = vadd.f32 %v546_v52, %v386_v53 }
 0x234   :  { %391 = vst.msk [vmem:[%s750_s10] sm:$0xff] %vm390_vm0, %v387_v54 }
 0x239   :  { %v388_v55 = vpop.f32.mrf.mxu2 }
 0x23a   :  { %396 = vsyncpa [#allocation5], 1 }
 0x23b   :  { %397 = vsyncpa [#allocation7], 1 }

</bundles_post_ra>
